<compile_context>
chip_gen: v7x
topology: tpu7x:2x2x1
jax: 0.10.0
libtpu: 0.0.40
codegen_flags: <defaults>
</compile_context>

<pallas_src>
import jax
import jax.numpy as jnp
from jax.experimental import pallas as pl
from jax.experimental.pallas import tpu as pltpu


def _round_up(a, b):
    return ((a + b - 1) // b) * b


def _vmem_capacity_bytes():
    try:
        cap = int(pltpu.get_tpu_info().vmem_capacity_bytes)
        if cap > 0:
            return cap
    except Exception:
        pass
    return 64 << 20      # conservative fallback: v7x per-TensorCore VMEM


def _resid_kernel(x_ref, w1_ref, b1_ref, w2_ref, b2_ref, o_ref):
    # Linear 1 + ReLU. Bias stays a (1, Hp) row; the broadcast-add lowers to
    # stride-0 sublane reads (no materialized (tile, Hp) broadcast).
    h = jnp.dot(x_ref[...], w1_ref[...], preferred_element_type=jnp.float32)
    h = jnp.maximum(h + b1_ref[...], 0.0)
    # (Dropout = identity in eval mode.)
    # Linear 2 + ReLU.
    h = jnp.dot(h, w2_ref[...], preferred_element_type=jnp.float32)
    h = jnp.maximum(h + b2_ref[...], 0.0)
    # Residual add: re-read x here so its vregs are not live across the matmuls.
    o_ref[...] = (x_ref[...] + h).astype(o_ref.dtype)


@jax.jit
def resid_layer(x, w1, b1, w2, b2):
    """x: [N, H]; w1, w2: [H, H] (already [in, out]); b1, b2: [1, H]."""
    N, H = x.shape
    Hp = _round_up(H, 128)            # lane-align the hidden dim
    Np = _round_up(N, 8)              # sublane-align the row dim (only)

    cap = _vmem_capacity_bytes()
    budget = int(0.75 * cap)

    # Row tile from a ~4 MiB x-tile byte target (HBM-bound kernel).
    tile = (4 << 20) // (4 * Hp)
    tile = max(256, min(2048, tile))
    tile = _round_up(min(tile, Np), 8)
    # Keep >=2 row blocks (v7x megacore) once a block is still much larger
    # than the per-grid-step overhead.
    if tile >= Np and Np * Hp * 4 >= (2 << 20):
        tile = _round_up((Np + 1) // 2, 8)

    # VMEM residency guard: f32 W1+W2 (+biases) stay resident, x/out tiles are
    # double-buffered. Shrink the row tile before giving up.
    weight_bytes = 2 * Hp * Hp * 4 + 2 * Hp * 4
    if weight_bytes > budget:
        # TODO(synk): K/N-tile W1/W2 (extra grid axes + f32 accumulator) for very large H.
        raise NotImplementedError(
            f"hidden_dim={H}: resident weights ({weight_bytes >> 20} MiB) exceed VMEM budget")
    while tile > 8 and weight_bytes + 2 * 2 * tile * Hp * 4 > budget:
        tile = _round_up(max(8, tile // 2), 8)

    grid = (pl.cdiv(Np, tile),)

    # Zero-pad (no-ops at aligned shapes); padded rows/cols are sliced off after.
    if Hp != H:
        w1 = jnp.pad(w1, ((0, Hp - H), (0, Hp - H)))
        w2 = jnp.pad(w2, ((0, Hp - H), (0, Hp - H)))
        b1 = jnp.pad(b1, ((0, 0), (0, Hp - H)))
        b2 = jnp.pad(b2, ((0, 0), (0, Hp - H)))
    xp = x if (Np == N and Hp == H) else jnp.pad(x, ((0, Np - N), (0, Hp - H)))

    w1 = w1.astype(jnp.float32)
    b1 = b1.astype(jnp.float32)
    w2 = w2.astype(jnp.float32)
    b2 = b2.astype(jnp.float32)

    vmem_est = (2 * 2 * tile * Hp * 4      # x + out tiles, double-buffered
                + weight_bytes)            # resident weights + biases
    vmem_limit = int(min(max(int(1.5 * vmem_est) + (4 << 20), 32 << 20),
                         cap - (8 << 20)))

    const2d = lambda i: (0, 0)
    out = pl.pallas_call(
        _resid_kernel,
        out_shape=jax.ShapeDtypeStruct((Np, Hp), x.dtype),
        grid_spec=pltpu.PrefetchScalarGridSpec(
            num_scalar_prefetch=0,
            grid=grid,
            in_specs=[
                pl.BlockSpec((tile, Hp), lambda i: (i, 0)),                      # x tile
                pl.BlockSpec((Hp, Hp), const2d, pipeline_mode=pl.Buffered(1)),   # W1
                pl.BlockSpec((1, Hp), const2d, pipeline_mode=pl.Buffered(1)),    # b1
                pl.BlockSpec((Hp, Hp), const2d, pipeline_mode=pl.Buffered(1)),   # W2
                pl.BlockSpec((1, Hp), const2d, pipeline_mode=pl.Buffered(1)),    # b2
            ],
            out_specs=pl.BlockSpec((tile, Hp), lambda i: (i, 0)),
        ),
        compiler_params=pltpu.CompilerParams(
            dimension_semantics=("parallel",),    # row axis -> megacore sharding
            vmem_limit_bytes=vmem_limit,
        ),
    )(xp, w1, b1, w2, b2)

    return out[:N, :H]


def init_params(key, hidden_dim, dtype=jnp.float32):
    """Deterministic init mimicking torch.nn.Linear default (U(-1/sqrt(H), 1/sqrt(H)))."""
    k1, k2, k3, k4 = jax.random.split(key, 4)
    bound = 1.0 / (hidden_dim ** 0.5)
    # Stored directly in [in, out] layout (== PyTorch weight transposed).
    w1 = jax.random.uniform(k1, (hidden_dim, hidden_dim), dtype, -bound, bound)
    b1 = jax.random.uniform(k2, (1, hidden_dim), dtype, -bound, bound)
    w2 = jax.random.uniform(k3, (hidden_dim, hidden_dim), dtype, -bound, bound)
    b2 = jax.random.uniform(k4, (1, hidden_dim), dtype, -bound, bound)
    return w1, b1, w2, b2


def resid_layer_ref(x, w1, b1, w2, b2):
    """Pure-JAX f32 reference matching the PyTorch eval-mode ResidLayer."""
    hi = jax.lax.Precision.HIGHEST
    h = jnp.maximum(jnp.dot(x, w1, precision=hi) + b1, 0.0)
    h = jnp.maximum(jnp.dot(h, w2, precision=hi) + b2, 0.0)
    return x + h


if __name__ == "__main__":
    hidden_dim = 128   # lane-aligned hidden size
    batch = 8          # rows (e.g. batch of location encodings)

    key = jax.random.PRNGKey(0)
    kx, kp = jax.random.split(key)
    x = jax.random.normal(kx, (batch, hidden_dim), jnp.float32)
    w1, b1, w2, b2 = init_params(kp, hidden_dim)

    out = jax.block_until_ready(resid_layer(x, w1, b1, w2, b2))

    ref = resid_layer_ref(x, w1, b1, w2, b2)
    assert out.shape == x.shape and out.dtype == x.dtype
    assert jnp.allclose(out, ref, atol=1e-2, rtol=1e-2), "mismatch vs reference"

    print("KERNEL_OK")
</pallas_src>

<mosaic_0001>
module attributes {stable_mosaic.version = 11 : i64} {
  func.func @_resid_kernel(%arg0: i32, %arg1: memref<8x128xf32, #tpu.memory_space<vmem>>, %arg2: memref<128x128xf32, #tpu.memory_space<vmem>>, %arg3: memref<1x128xf32, #tpu.memory_space<vmem>>, %arg4: memref<128x128xf32, #tpu.memory_space<vmem>>, %arg5: memref<1x128xf32, #tpu.memory_space<vmem>>, %arg6: memref<8x128xf32, #tpu.memory_space<vmem>>) attributes {dimension_semantics = [#tpu.dimension_semantics<parallel>], iteration_bounds = array<i64: 1>, scalar_prefetch = 0 : i64, scratch_operands = 0 : i64, tpu.core_type = #tpu.core_type<tc>, window_params = [{transform_indices = @transform_0, window_bounds = array<i64: 8, 128>}, {pipeline_mode = #tpu.pipeline_mode<synchronous>, transform_indices = @transform_1, window_bounds = array<i64: 128, 128>}, {pipeline_mode = #tpu.pipeline_mode<synchronous>, transform_indices = @transform_2, window_bounds = array<i64: 1, 128>}, {pipeline_mode = #tpu.pipeline_mode<synchronous>, transform_indices = @transform_3, window_bounds = array<i64: 128, 128>}, {pipeline_mode = #tpu.pipeline_mode<synchronous>, transform_indices = @transform_4, window_bounds = array<i64: 1, 128>}, {transform_indices = @transform_5, window_bounds = array<i64: 8, 128>}]} {
    %c0 = arith.constant 0 : index
    %c0_0 = arith.constant 0 : index
    %0 = vector.load %arg1[%c0, %c0_0] : memref<8x128xf32, #tpu.memory_space<vmem>>, vector<8x128xf32>
    %c0_1 = arith.constant 0 : index
    %c0_2 = arith.constant 0 : index
    %1 = vector.load %arg2[%c0_1, %c0_2] : memref<128x128xf32, #tpu.memory_space<vmem>>, vector<128x128xf32>
    %cst = arith.constant dense<0.000000e+00> : vector<8x128xf32>
    %2 = tpu.matmul %0, %1, %cst {dimension_numbers = #tpu.dot_dimension_numbers<[1], [0], [0], [1], [0, 0, 1, 1], [], []>} : vector<8x128xf32>, vector<128x128xf32>, vector<8x128xf32> -> vector<8x128xf32>
    %c0_3 = arith.constant 0 : index
    %c0_4 = arith.constant 0 : index
    %3 = vector.load %arg3[%c0_3, %c0_4] : memref<1x128xf32, #tpu.memory_space<vmem>>, vector<1x128xf32>
    %4 = vector.broadcast %3 : vector<1x128xf32> to vector<8x128xf32>
    %5 = arith.addf %2, %4 : vector<8x128xf32>
    %cst_5 = arith.constant 0.000000e+00 : f32
    %6 = vector.broadcast %cst_5 : f32 to vector<8x128xf32>
    %7 = arith.maximumf %5, %6 : vector<8x128xf32>
    %c0_6 = arith.constant 0 : index
    %c0_7 = arith.constant 0 : index
    %8 = vector.load %arg4[%c0_6, %c0_7] : memref<128x128xf32, #tpu.memory_space<vmem>>, vector<128x128xf32>
    %cst_8 = arith.constant dense<0.000000e+00> : vector<8x128xf32>
    %9 = tpu.matmul %7, %8, %cst_8 {dimension_numbers = #tpu.dot_dimension_numbers<[1], [0], [0], [1], [0, 0, 1, 1], [], []>} : vector<8x128xf32>, vector<128x128xf32>, vector<8x128xf32> -> vector<8x128xf32>
    %c0_9 = arith.constant 0 : index
    %c0_10 = arith.constant 0 : index
    %10 = vector.load %arg5[%c0_9, %c0_10] : memref<1x128xf32, #tpu.memory_space<vmem>>, vector<1x128xf32>
    %11 = vector.broadcast %10 : vector<1x128xf32> to vector<8x128xf32>
    %12 = arith.addf %9, %11 : vector<8x128xf32>
    %cst_11 = arith.constant 0.000000e+00 : f32
    %13 = vector.broadcast %cst_11 : f32 to vector<8x128xf32>
    %14 = arith.maximumf %12, %13 : vector<8x128xf32>
    %c0_12 = arith.constant 0 : index
    %c0_13 = arith.constant 0 : index
    %15 = vector.load %arg1[%c0_12, %c0_13] : memref<8x128xf32, #tpu.memory_space<vmem>>, vector<8x128xf32>
    %16 = arith.addf %15, %14 : vector<8x128xf32>
    %c0_14 = arith.constant 0 : index
    %c0_15 = arith.constant 0 : index
    %17 = vector.load %arg6[%c0_14, %c0_15] : memref<8x128xf32, #tpu.memory_space<vmem>>, vector<8x128xf32>
    tpu.vector_store %arg6[%c0_14, %c0_15], %16 {strides = array<i32>} : memref<8x128xf32, #tpu.memory_space<vmem>>, vector<8x128xf32>,
    return
  }
  func.func @transform_0(%arg0: i32) -> (i32, i32) {
    %c0_i32 = arith.constant 0 : i32
    %c0_i32_0 = arith.constant 0 : i32
    return %arg0, %c0_i32 : i32, i32
  }
  func.func @transform_1(%arg0: i32) -> (i32, i32) {
    %c0_i32 = arith.constant 0 : i32
    %c0_i32_0 = arith.constant 0 : i32
    %c0_i32_1 = arith.constant 0 : i32
    return %c0_i32, %c0_i32_0 : i32, i32
  }
  func.func @transform_2(%arg0: i32) -> (i32, i32) {
    %c0_i32 = arith.constant 0 : i32
    %c0_i32_0 = arith.constant 0 : i32
    %c0_i32_1 = arith.constant 0 : i32
    return %c0_i32, %c0_i32_0 : i32, i32
  }
  func.func @transform_3(%arg0: i32) -> (i32, i32) {
    %c0_i32 = arith.constant 0 : i32
    %c0_i32_0 = arith.constant 0 : i32
    %c0_i32_1 = arith.constant 0 : i32
    return %c0_i32, %c0_i32_0 : i32, i32
  }
  func.func @transform_4(%arg0: i32) -> (i32, i32) {
    %c0_i32 = arith.constant 0 : i32
    %c0_i32_0 = arith.constant 0 : i32
    %c0_i32_1 = arith.constant 0 : i32
    return %c0_i32, %c0_i32_0 : i32, i32
  }
  func.func @transform_5(%arg0: i32) -> (i32, i32) {
    %c0_i32 = arith.constant 0 : i32
    %c0_i32_0 = arith.constant 0 : i32
    return %arg0, %c0_i32 : i32, i32
  }
}

</mosaic_0001>

<bundles_post_ra>
// kernel: resid_layer.1
= control target key start
LH: loop header
LB: loop body
LE: loop exit
PB: predicated region body
PF: predicated region fallthrough
CT: control target
= control target key end

     0   :  { %10 = vsyncpa [#allocation3], 0  ;;  %s639_s0 = inlined_call_operand.hbm [shape: f32[8,128], index: 0, kind: input, shape index: {}]   ;;  %s640_s1 = inlined_call_operand.hbm [shape: f32[128,128], index: 1, kind: input, shape index: {}]   ;;  %s641_s2 = inlined_call_operand.vmem [shape: f32[1,128], index: 2, kind: input, shape index: {}]   ;;  %s642_s3 = inlined_call_operand.hbm [shape: f32[128,128], index: 3, kind: input, shape index: {}]   ;;  %s643_s4 = inlined_call_operand.vmem [shape: f32[1,128], index: 4, kind: input, shape index: {}]   ;;  %s644_s5 = inlined_call_operand.hbm [shape: f32[8,128], index: 5, kind: output, shape index: {}]  }
   0x1   :  { %11 = vsyncpa [#allocation6], 0 }
   0x2   :  { %12 = vsyncpa [#allocation4], 0  ;;  %s524_s18 = smov [#allocation5]   ;;  %s430_s22 = scalar_lea.hbm %s640_s1, 2048 }
   0x3   :  { %s28_s19 = sshll.u32 %s524_s18, 4  ;;  %p431_p0 = scmp.ne.s32.totalorder %s640_s1, %s430_s22  ;;  %s29_s19 = int_to_ptr.vmem [resolvable:$true] %s28_s19 }
   0x4   :  { %p434_p1 = scmp.lt.u32.totalorder %s430_s22, %s640_s1 }
   0x6   :  { %p436_p2 = pnand %p434_p1, %p431_p0 }
   0x8   :  { %439 = shalt.err (!%p436_p2)
}
   0x9   :  { %s440_s27 = scalar_lea.vmem %s29_s19, 2048  ;;  %p445_p4 = scmp.lt.s32.totalorder %s29_s19, %s29_s19 }
   0xa   :  { %p441_p3 = scmp.ne.s32.totalorder %s29_s19, %s440_s27  ;;  %p446_p5 = scmp.lt.s32.totalorder %s440_s27, %s440_s27 }
   0xc   :  { %p447_p6 = por %p446_p5, %p445_p4 }
   0xe   :  { %p448_p7 = pnand %p447_p6, %p441_p3 }
  0x10   :  { %451 = shalt.err (!%p448_p7)
}
  0x11   :  { %s525_s28 = smov 128   ;;  %s526_s29 = smov 8  }
  0x12   :  { %34 = dma.hbm_to_vmem [thread:$0]  %s640_s1, 2048, %s29_s19, [#allocation6], %s525_s28, %s525_s28, %s526_s29  }
  0x13   :  { %s527_s7 = smov [#allocation2]   ;;  %s528_s9 = smov [#allocation7]  }
  0x14   :  { %s19_s8 = sshll.u32 %s527_s7, 4  ;;  %s42_s10 = sshll.u32 %s528_s9, 4  ;;  %s20_s8 = int_to_ptr.vmem [resolvable:$true] %s19_s8  ;;  %s43_s10 = int_to_ptr.vmem [resolvable:$true] %s42_s10 }
  0x15   :  { %s452_s13 = scalar_lea.hbm %s639_s0, 128 }
  0x16   :  { %p453_p8 = scmp.ne.s32.totalorder %s639_s0, %s452_s13  ;;  %p456_p9 = scmp.lt.u32.totalorder %s452_s13, %s639_s0 }
  0x18   :  { %p458_p10 = pnand %p456_p9, %p453_p8 }
  0x1a   :  { %461 = shalt.err (!%p458_p10)
}
  0x1b   :  { %s462_s1 = scalar_lea.vmem %s20_s8, 128  ;;  %p467_p12 = scmp.lt.s32.totalorder %s20_s8, %s20_s8 }
  0x1c   :  { %p463_p11 = scmp.ne.s32.totalorder %s20_s8, %s462_s1  ;;  %p468_p13 = scmp.lt.s32.totalorder %s462_s1, %s462_s1 }
  0x1e   :  { %p469_p0 = por %p468_p13, %p467_p12 }
  0x20   :  { %p470_p1 = pnand %p469_p0, %p463_p11 }
  0x22   :  { %473 = shalt.err (!%p470_p1)
}
  0x23   :  { %22 = dma.hbm_to_vmem [thread:$0]  %s639_s0, 128, %s20_s8, [#allocation3]  }
  0x24   :  { %s474_s22 = scalar_lea.hbm %s642_s3, 2048 }
  0x25   :  { %p475_p2 = scmp.ne.s32.totalorder %s642_s3, %s474_s22  ;;  %p478_p3 = scmp.lt.u32.totalorder %s474_s22, %s642_s3 }
  0x27   :  { %p480_p4 = pnand %p478_p3, %p475_p2 }
  0x29   :  { %483 = shalt.err (!%p480_p4)
}
  0x2a   :  { %s484_s27 = scalar_lea.vmem %s43_s10, 2048  ;;  %p489_p6 = scmp.lt.s32.totalorder %s43_s10, %s43_s10 }
  0x2b   :  { %p485_p5 = scmp.ne.s32.totalorder %s43_s10, %s484_s27  ;;  %p490_p7 = scmp.lt.s32.totalorder %s484_s27, %s484_s27 }
  0x2d   :  { %p491_p8 = por %p490_p7, %p489_p6 }
  0x2f   :  { %p492_p9 = pnand %p491_p8, %p485_p5 }
  0x31   :  { %495 = shalt.err (!%p492_p9)
}
  0x32   :  { %48 = dma.hbm_to_vmem [thread:$0]  %s642_s3, 2048, %s43_s10, [#allocation6], %s525_s28, %s525_s28, %s526_s29  }
  0x33   :  { %518 = dma.done.wait [#allocation3], 128  }
  0x34   :  { %519 = vsyncadd [#allocation3], 4294967168 }
  0x35   :  { %520 = dma.done.wait [#allocation6], 4096  }
  0x36   :  { %521 = vsyncadd [#allocation6], 4294963200  ;;  %v529_v0 = vmov 0.0|0.0   ;;  %vm530_vm0 = vmmov 0   ;;  %v531_v1 = vmov 0.0   ;;  %v61_v2 = vld [vmem:[#allocation5] sm:$0xff] }
  0x37   :  { %373 = vmatprep.subr.bf16.mxu0 %v529_v0  ;;  %335 = vmatprep.mubr.msk.f32.mxu0 %vm530_vm0, %v531_v1  ;;  %v62_v3 = vld [vmem:[#allocation5 + $0x8] sm:$0xff]  ;;  %v63_v4 = vld [vmem:[#allocation5 + $0x10] sm:$0xff]  ;;  %v64_v6 = vld [vmem:[#allocation5 + $0x18] sm:$0xff]  ;;  %s532_s7 = smov [#allocation8]  }
  0x38   :  { %397 = vmatprep.subr.bf16.mxu1 %v529_v0  ;;  %370 = vmatprep.mubr.msk.f32.mxu1 %vm530_vm0, %v531_v1  ;;  %v374_v5 = vpack.c.bf16 %v62_v3, %v61_v2  ;;  %v377_v7 = vpack.c.bf16 %v64_v6, %v63_v4  ;;  %v65_v8 = vld [vmem:[#allocation5 + $0x20] sm:$0xff]  ;;  %v66_v9 = vld [vmem:[#allocation5 + $0x28] sm:$0xff]  ;;  %v157_v12 = vld [vmem:[#allocation7 + $0x10] sm:$0xff]  ;;  %s257_s8 = sshll.u32 %s532_s7, 4  ;;  %s258_s8 = int_to_ptr.vmem [resolvable:$true] %s257_s8 }
  0x39   :  { %v155_v10 = vld [vmem:[#allocation7] sm:$0xff]  ;;  %v156_v11 = vld [vmem:[#allocation7 + $0x8] sm:$0xff]  ;;  %v158_v13 = vld [vmem:[#allocation7 + $0x18] sm:$0xff]  ;;  %v380_v14 = vpack.c.bf16 %v66_v9, %v65_v8  ;;  %s496_s9 = scalar_lea.vmem %s258_s8, 128  ;;  %p501_p11 = scmp.lt.s32.totalorder %s258_s8, %s258_s8 }
  0x3a   :  { %375 = vmatpush3.bf16.msra.mxu0 %v374_v5  ;;  %v398_v15 = vpack.c.bf16 %v156_v11, %v155_v10  ;;  %v67_v16 = vld [vmem:[#allocation5 + $0x30] sm:$0xff]  ;;  %v68_v17 = vld [vmem:[#allocation5 + $0x38] sm:$0xff]  ;;  %v401_v18 = vpack.c.bf16 %v158_v13, %v157_v12  ;;  %v159_v19 = vld [vmem:[#allocation7 + $0x20] sm:$0xff]  ;;  %p497_p10 = scmp.ne.s32.totalorder %s258_s8, %s496_s9  ;;  %p502_p12 = scmp.lt.s32.totalorder %s496_s9, %s496_s9 }
  0x3b   :  { %376 = vmatprep.subr.bf16.mxu0 %v529_v0  ;;  %v160_v20 = vld [vmem:[#allocation7 + $0x28] sm:$0xff]  ;;  %v383_v21 = vpack.c.bf16 %v68_v17, %v67_v16  ;;  %v69_v22 = vld [vmem:[#allocation5 + $0x40] sm:$0xff]  ;;  %v161_v25 = vld [vmem:[#allocation7 + $0x30] sm:$0xff] }
  0x3c   :  { %399 = vmatpush3.bf16.msra.mxu1 %v398_v15  ;;  %v70_v23 = vld [vmem:[#allocation5 + $0x48] sm:$0xff]  ;;  %v404_v24 = vpack.c.bf16 %v160_v20, %v159_v19  ;;  %v162_v26 = vld [vmem:[#allocation7 + $0x38] sm:$0xff]  ;;  %v71_v28 = vld [vmem:[#allocation5 + $0x50] sm:$0xff]  ;;  %p503_p13 = por %p502_p12, %p501_p11 }
  0x3d   :  { %400 = vmatprep.subr.bf16.mxu1 %v529_v0  ;;  %v386_v27 = vpack.c.bf16 %v70_v23, %v69_v22  ;;  %v72_v29 = vld [vmem:[#allocation5 + $0x58] sm:$0xff]  ;;  %v407_v30 = vpack.c.bf16 %v162_v26, %v161_v25  ;;  %v163_v31 = vld [vmem:[#allocation7 + $0x40] sm:$0xff]  ;;  %v164_v32 = vld [vmem:[#allocation7 + $0x48] sm:$0xff] }
  0x3e   :  { %378 = vmatpush3.bf16.msra.mxu0 %v377_v7  ;;  %v389_v33 = vpack.c.bf16 %v72_v29, %v71_v28  ;;  %v73_v34 = vld [vmem:[#allocation5 + $0x60] sm:$0xff]  ;;  %v74_v35 = vld [vmem:[#allocation5 + $0x68] sm:$0xff]  ;;  %v410_v36 = vpack.c.bf16 %v164_v32, %v163_v31  ;;  %v165_v37 = vld [vmem:[#allocation7 + $0x50] sm:$0xff]  ;;  %p504_p0 = pnand %p503_p13, %p497_p10 }
  0x3f   :  { %379 = vmatprep.subr.bf16.mxu0 %v529_v0  ;;  %v166_v38 = vld [vmem:[#allocation7 + $0x58] sm:$0xff]  ;;  %v392_v39 = vpack.c.bf16 %v74_v35, %v73_v34  ;;  %v75_v40 = vld [vmem:[#allocation5 + $0x70] sm:$0xff]  ;;  %v167_v43 = vld [vmem:[#allocation7 + $0x60] sm:$0xff] }
  0x40   :  { %402 = vmatpush3.bf16.msra.mxu1 %v401_v18  ;;  %v76_v41 = vld [vmem:[#allocation5 + $0x78] sm:$0xff]  ;;  %v413_v42 = vpack.c.bf16 %v166_v38, %v165_v37  ;;  %v168_v44 = vld [vmem:[#allocation7 + $0x68] sm:$0xff]  ;;  %v169_v48 = vld [vmem:[#allocation7 + $0x70] sm:$0xff] }
  0x41   :  { %403 = vmatprep.subr.bf16.mxu1 %v529_v0  ;;  %v395_v45 = vpack.c.bf16 %v76_v41, %v75_v40  ;;  %v416_v46 = vpack.c.bf16 %v168_v44, %v167_v43  ;;  %v60_v47 = vld [vmem:[#allocation2] sm:$0xff] }
  0x42   :  { %381 = vmatpush3.bf16.msra.mxu0 %v380_v14  ;;  %v170_v49 = vld [vmem:[#allocation7 + $0x78] sm:$0xff] }
  0x43   :  { %382 = vmatprep.subr.bf16.mxu0 %v529_v0  ;;  %v419_v50 = vpack.c.bf16 %v170_v49, %v169_v48  ;;  %v267_v51 = vld [vmem:[%s641_s2] ss:$0 sm:$0xff] }
  0x44   :  { %405 = vmatpush3.bf16.msra.mxu1 %v404_v24  ;;  %v268_v56 = vld [vmem:[%s643_s4] ss:$0 sm:$0xff] }
  0x45   :  { %406 = vmatprep.subr.bf16.mxu1 %v529_v0 }
  0x46   :  { %384 = vmatpush3.bf16.msra.mxu0 %v383_v21 }
  0x47   :  { %385 = vmatprep.subr.bf16.mxu0 %v529_v0 }
  0x48   :  { %408 = vmatpush3.bf16.msra.mxu1 %v407_v30 }
  0x49   :  { %409 = vmatprep.subr.bf16.mxu1 %v529_v0 }
  0x4a   :  { %387 = vmatpush3.bf16.msra.mxu0 %v386_v27 }
  0x4b   :  { %388 = vmatprep.subr.bf16.mxu0 %v529_v0 }
  0x4c   :  { %411 = vmatpush3.bf16.msra.mxu1 %v410_v36 }
  0x4d   :  { %412 = vmatprep.subr.bf16.mxu1 %v529_v0 }
  0x4e   :  { %390 = vmatpush3.bf16.msra.mxu0 %v389_v33 }
  0x4f   :  { %391 = vmatprep.subr.bf16.mxu0 %v529_v0 }
  0x50   :  { %414 = vmatpush3.bf16.msra.mxu1 %v413_v42 }
  0x51   :  { %415 = vmatprep.subr.bf16.mxu1 %v529_v0 }
  0x52   :  { %393 = vmatpush3.bf16.msra.mxu0 %v392_v39 }
  0x53   :  { %394 = vmatprep.subr.bf16.mxu0 %v529_v0 }
  0x54   :  { %417 = vmatpush3.bf16.msra.mxu1 %v416_v46 }
  0x55   :  { %418 = vmatprep.subr.bf16.mxu1 %v529_v0 }
  0x56   :  { %396 = vmatpush3.bf16.msra.mxu0 %v395_v45 }
  0x58   :  { %420 = vmatpush3.bf16.msra.mxu1 %v419_v50 }
  0x59   :  { %336 = vmatmul.mubr.f32.vlgmr.msra.gmra.mrb[0].mxu0 %v60_v47 }
 0x12c   :  { %v150_v52 = vpop.f32.mrb[0].mxu0 }
 0x12d   :  { %v151_v53 = vadd.f32 %v267_v51, %v150_v52  ;;  %v337_v54 = vpop.f32.mrb[1].mxu0 }
 0x12f   :  { %v154_v55 = vmax.f32 %v151_v53, 0.0 }
 0x131   :  { %371 = vmatmul.mubr.f32.vlgmr.msra.gmra.mrb[0].mxu1 %v154_v55 }
 0x204   :  { %v244_v57 = vpop.f32.mrb[0].mxu1 }
 0x205   :  { %v245_v58 = vadd.f32 %v268_v56, %v244_v57  ;;  %v372_v59 = vpop.f32.mrb[1].mxu1 }
 0x207   :  { %v248_v60 = vmax.f32 %v245_v58, 0.0 }
 0x209   :  { %v249_v61 = vadd.f32 %v248_v60, %v60_v47 }
 0x20b   :  { %250 = vst [vmem:[#allocation8] sm:$0xff] %v249_v61 }
 0x20c   :  { %507 = shalt.err (!%p504_p0)
}
 0x20d   :  { %s508_s4 = scalar_lea.hbm %s644_s5, 128 }
 0x20e   :  { %p509_p1 = scmp.ne.s32.totalorder %s644_s5, %s508_s4  ;;  %p512_p2 = scmp.lt.u32.totalorder %s508_s4, %s644_s5 }
 0x210   :  { %p514_p3 = pnand %p512_p2, %p509_p1 }
 0x212   :  { %517 = shalt.err (!%p514_p3)
}
 0x213   :  { %260 = dma.vmem_to_hbm [thread:$0]  %s258_s8, 128, %s644_s5, [#allocation4]  }
 0x214   :  { %522 = dma.done.wait [#allocation4], 128  }
 0x215   :  { %523 = vsyncadd [#allocation4], 4294967168 }
 0x216   :  { %264 = vsyncpa [#allocation3], 1 }
 0x217   :  { %265 = vsyncpa [#allocation6], 1 }
 0x218   :  { %266 = vsyncpa [#allocation4], 1 }

</bundles_post_ra>
